<compile_context>
chip_gen: v7x
topology: tpu7x:2x2x1
jax: 0.10.0
libtpu: 0.0.40
codegen_flags: <defaults>
</compile_context>

<pallas_src>
import functools

import jax
import jax.numpy as jnp
from jax import lax
from jax.experimental import pallas as pl
from jax.experimental.pallas import tpu as pltpu


_LANES = 128
_PAD_LOGIT = -1e4     # sigmoid(-1e4) == 0, max(-1e4,0) == 0, log(1+exp(-1e4)) == 0


def _cdiv(a, b):
    return -(-a // b)


def _sublane_multiple(dtype):
    return {4: 8, 2: 16, 1: 32}.get(jnp.dtype(dtype).itemsize, 8)


def _choose_packing(n, d0, sub, r_target):
    """Largest k with k | d0, (n*k) % sub == 0, (d0/k) % 128 == 0, n*k <= r_target."""
    best = 1
    kmax = max(1, min(d0, r_target // max(n, 1)))
    for k in range(1, kmax + 1):
        if d0 % k:
            continue
        if (n * k) % sub:
            continue
        if (d0 // k) % _LANES:
            continue
        best = k
    return best


def _device_defaults():
    """Per-generation tuning: (n_core_split, target_block_bytes, vmem_limit_bytes)."""
    kind = ""
    try:
        kind = jax.devices()[0].device_kind.lower()
    except Exception:
        pass
    if "v7" in kind:
        # 2 TensorCores / 64 MiB VMEM: split the feature reduction, smaller blocks.
        return 2, 4 << 20, 48 * 1024 * 1024
    # v5e / v6e: single TensorCore, 128 MiB VMEM: no split, bigger blocks.
    return 1, 6 << 20, 64 * 1024 * 1024


def _bce_dice_kernel(pred_ref, targ_ref, num_ref, den_ref, bce_ref, *,
                     p, td, nj, d, unroll, needs_mask):
    c = pl.program_id(0)
    j = pl.program_id(1)

    @pl.when(j == 0)
    def _init():
        num_ref[...] = jnp.zeros_like(num_ref)
        den_ref[...] = jnp.zeros_like(den_ref)
        bce_ref[...] = jnp.zeros_like(bce_ref)

    n_chunks = td // _LANES
    r = pred_ref.shape[0]
    tile_start = (c * nj + j) * td            # nominal (unclamped) column offset

    def chunk(cc, masked):
        start = pl.multiple_of(cc * _LANES, _LANES)
        x = pred_ref[:, pl.ds(start, _LANES)].astype(jnp.float32)
        y = targ_ref[:, pl.ds(start, _LANES)].astype(jnp.float32)
        if masked:
            col = (tile_start + cc * _LANES
                   + lax.broadcasted_iota(jnp.int32, (r, _LANES), 1))
            valid = col < d
            x = jnp.where(valid, x, _PAD_LOGIT)   # -> exactly zero contribution
            y = jnp.where(valid, y, 0.0)

        # One shared transcendental: e = exp(-|x|) feeds both the numerically
        # stable BCE-with-logits log-term and the sigmoid.
        e = jnp.exp(-jnp.abs(x))
        a = 1.0 + e
        inv = pl.reciprocal(a, approx=True)       # EUP slot
        inv = inv * (2.0 - a * inv)               # one Newton step -> ~f32 accuracy
        prob = jnp.where(x >= 0.0, inv, e * inv)  # == sigmoid(x)
        bce_c = jnp.maximum(x, 0.0) - x * y + jnp.log(a)
        num_c = prob * y
        if p == 2:
            den_c = prob * prob + y * y           # integer power: plain VPU muls
        else:
            den_c = prob ** p + y ** p

        # Lane-dense accumulation straight into the resident output refs.
        num_ref[...] += num_c
        den_ref[...] += den_c
        bce_ref[...] += bce_c

    def run(masked):
        def body(cc, carry):
            chunk(cc, masked)
            return carry
        lax.fori_loop(0, n_chunks, body, 0, unroll=unroll)

    if needs_mask:
        is_full = tile_start + td <= d
        @pl.when(is_full)
        def _hot():
            run(False)
        @pl.when(jnp.logical_not(is_full))
        def _edge():
            run(True)
    else:
        run(False)


def bce_dice_loss_logits(predict, target, *, smooth=1.0, p=2,
                         reduction="mean", weight_dice=0.5,
                         r_target=64, target_block_bytes=None,
                         max_feat_tile=16384, n_core_split=None,
                         vmem_limit_bytes=None):
    """Pallas implementation of BCEDiceLoss_Logits (mean / sum / none)."""
    assert predict.shape[0] == target.shape[0], \
        "predict & target batch size don't match"
    assert predict.shape == target.shape, "predict & target shapes must match"

    split_def, blk_def, vmem_def = _device_defaults()
    if n_core_split is None:
        n_core_split = split_def
    if target_block_bytes is None:
        target_block_bytes = blk_def
    if vmem_limit_bytes is None:
        vmem_limit_bytes = vmem_def

    n = predict.shape[0]
    d0 = 1
    for s in predict.shape[1:]:
        d0 *= s
    pred2 = predict.reshape(n, d0)          # native dtype, no wrapper upcast
    targ2 = target.reshape(n, d0)

    # Dtype-aware sublane packing: fill vregs even for tiny batches; per-row
    # Dice sums are recovered in the finalize step.
    sub = max(_sublane_multiple(pred2.dtype), _sublane_multiple(targ2.dtype))
    k = _choose_packing(n, d0, sub, r_target)
    r = n * k
    d = d0 // k
    pred2 = pred2.reshape(r, d)
    targ2 = targ2.reshape(r, d)

    # Tiny inputs only: guarantee at least one full 128-lane chunk (pad values
    # contribute exactly zero, so no masking is needed for them).
    if d < _LANES:
        pad = _LANES - d
        pred2 = jnp.pad(pred2, ((0, 0), (0, pad)), constant_values=_PAD_LOGIT)
        targ2 = jnp.pad(targ2, ((0, 0), (0, pad)), constant_values=0)
        d = _LANES

    # Feature tile sizing: lane-dense, bounded by VMEM target and array width.
    itemsize = max(jnp.dtype(pred2.dtype).itemsize,
                   jnp.dtype(targ2.dtype).itemsize)
    td = target_block_bytes // (r * itemsize)
    td = max(_LANES, (td // _LANES) * _LANES)
    td = min(td, max_feat_tile)
    td = min(td, (d // _LANES) * _LANES)     # block never wider than the array

    n_tiles = _cdiv(d, td)
    n_split = max(1, min(n_core_split, n_tiles))
    nj = _cdiv(n_tiles, n_split)
    needs_mask = (n_split * nj * td != d)    # ragged tail handled in-kernel

    n_chunks = td // _LANES
    unroll = 4 if n_chunks % 4 == 0 else (2 if n_chunks % 2 == 0 else 1)

    kernel = functools.partial(_bce_dice_kernel, p=p, td=td, nj=nj, d=d,
                               unroll=unroll, needs_mask=needs_mask)
    acc_shape = jax.ShapeDtypeStruct((n_split, r, _LANES), jnp.float32)

    last_tile = n_tiles - 1

    def in_map(c, j):
        # Clamp so duplicate / overhanging tiles still DMA a valid block; the
        # kernel masks their (nominal) columns to zero contribution.
        return (0, jnp.minimum(c * nj + j, last_tile))

    out_map = lambda c, j: (c, 0, 0)

    num_p, den_p, bce_p = pl.pallas_call(
        kernel,
        out_shape=(acc_shape, acc_shape, acc_shape),
        grid_spec=pltpu.PrefetchScalarGridSpec(
            num_scalar_prefetch=0,
            grid=(n_split, nj),
            in_specs=[
                pl.BlockSpec((r, td), in_map),
                pl.BlockSpec((r, td), in_map),
            ],
            out_specs=[
                pl.BlockSpec((None, r, _LANES), out_map),
                pl.BlockSpec((None, r, _LANES), out_map),
                pl.BlockSpec((None, r, _LANES), out_map),
            ],
        ),
        compiler_params=pltpu.CompilerParams(
            dimension_semantics=("parallel", "arbitrary"),
            vmem_limit_bytes=vmem_limit_bytes),
    )(pred2, targ2)

    # Tiny finalize in plain JAX: cross-lane/core reduce, un-pack rows, Dice.
    num_row = num_p.sum(axis=(0, 2)).reshape(n, k).sum(axis=1)     # (N,)
    den_row = den_p.sum(axis=(0, 2)).reshape(n, k).sum(axis=1)     # (N,)
    bce_mean = bce_p.sum() / (n * d0)                              # scalar

    dice = 1.0 - (num_row + smooth) / (den_row + smooth)           # (N,)
    w = weight_dice
    if reduction == "mean":
        return w * dice.mean() + (1.0 - w) * bce_mean
    elif reduction == "sum":
        return w * dice.sum() + (1.0 - w) * bce_mean
    elif reduction == "none":
        return w * dice + (1.0 - w) * bce_mean
    else:
        raise Exception("Unexpected reduction {}".format(reduction))


def _reference(predict, target, smooth=1.0, p=2, weight_dice=0.5):
    """Pure-JAX reference mirroring the PyTorch forward (reduction='mean')."""
    n = predict.shape[0]
    x = predict.reshape(n, -1).astype(jnp.float32)
    y = target.reshape(n, -1).astype(jnp.float32)
    bce = jnp.mean(jnp.maximum(x, 0.0) - x * y + jnp.log1p(jnp.exp(-jnp.abs(x))))
    prob = jax.nn.sigmoid(x)
    num = jnp.sum(prob * y, axis=1) + smooth
    den = jnp.sum(prob ** p + y ** p, axis=1) + smooth
    dice = 1.0 - num / den
    return weight_dice * jnp.mean(dice) + (1.0 - weight_dice) * bce


if __name__ == "__main__":
    key = jax.random.PRNGKey(0)
    k1, k2, k3, k4 = jax.random.split(key, 4)

    # NCHW-shaped logits/targets like the PyTorch module would receive.
    shape = (2, 4, 16, 16)
    predict = jax.random.normal(k1, shape, dtype=jnp.float32) * 2.0
    target = jax.random.bernoulli(k2, p=0.3, shape=shape).astype(jnp.float32)
    loss = jax.block_until_ready(bce_dice_loss_logits(predict, target))
    ref = _reference(predict, target)
    assert jnp.allclose(loss, ref, rtol=1e-5, atol=2e-5), (loss, ref)

    # Ragged feature dim (not a multiple of 128) exercises the in-kernel mask.
    shape2 = (2, 3, 7, 9)
    predict2 = jax.random.normal(k3, shape2, dtype=jnp.float32) * 2.0
    target2 = jax.random.bernoulli(k4, p=0.4, shape=shape2).astype(jnp.float32)
    loss2 = jax.block_until_ready(bce_dice_loss_logits(predict2, target2))
    ref2 = _reference(predict2, target2)
    assert jnp.allclose(loss2, ref2, rtol=1e-5, atol=2e-5), (loss2, ref2)

    print("KERNEL_OK")
</pallas_src>

<mosaic_0001>
module attributes {stable_mosaic.version = 11 : i64} {
  func.func @_bce_dice_kernel(%arg0: i32, %arg1: i32, %arg2: memref<16x128xf32, #tpu.memory_space<vmem>>, %arg3: memref<16x128xf32, #tpu.memory_space<vmem>>, %arg4: memref<1x16x128xf32, #tpu.memory_space<vmem>>, %arg5: memref<1x16x128xf32, #tpu.memory_space<vmem>>, %arg6: memref<1x16x128xf32, #tpu.memory_space<vmem>>) attributes {dimension_semantics = [#tpu.dimension_semantics<parallel>, #tpu.dimension_semantics<arbitrary>], iteration_bounds = array<i64: 1, 1>, scalar_prefetch = 0 : i64, scratch_operands = 0 : i64, tpu.core_type = #tpu.core_type<tc>, window_params = [{transform_indices = @transform_0, window_bounds = array<i64: 16, 128>}, {transform_indices = @transform_1, window_bounds = array<i64: 16, 128>}, {transform_indices = @transform_2, window_bounds = array<i64: 1, 16, 128>}, {transform_indices = @transform_3, window_bounds = array<i64: 1, 16, 128>}, {transform_indices = @transform_4, window_bounds = array<i64: 1, 16, 128>}]} {
    %c0_i32 = arith.constant 0 : i32
    %0 = arith.cmpi eq, %arg1, %c0_i32 : i32
    %1 = arith.extui %0 : i1 to i32
    %c0_i32_0 = arith.constant 0 : i32
    %2 = arith.cmpi ne, %1, %c0_i32_0 : i32
    scf.if %2 {
      %cst_25 = arith.constant 0.000000e+00 : f32
      %52 = vector.broadcast %cst_25 : f32 to vector<16x128xf32>
      %c0_26 = arith.constant 0 : index
      %c0_27 = arith.constant 0 : index
      %c0_28 = arith.constant 0 : index
      %53 = vector.load %arg4[%c0_26, %c0_27, %c0_28] : memref<1x16x128xf32, #tpu.memory_space<vmem>>, vector<1x16x128xf32>
      %54 = vector.shape_cast %53 : vector<1x16x128xf32> to vector<16x128xf32>
      %55 = vector.shape_cast %52 : vector<16x128xf32> to vector<1x16x128xf32>
      tpu.vector_store %arg4[%c0_26, %c0_27, %c0_28], %55 {strides = array<i32>} : memref<1x16x128xf32, #tpu.memory_space<vmem>>, vector<1x16x128xf32>,
      %cst_29 = arith.constant 0.000000e+00 : f32
      %56 = vector.broadcast %cst_29 : f32 to vector<16x128xf32>
      %c0_30 = arith.constant 0 : index
      %c0_31 = arith.constant 0 : index
      %c0_32 = arith.constant 0 : index
      %57 = vector.load %arg5[%c0_30, %c0_31, %c0_32] : memref<1x16x128xf32, #tpu.memory_space<vmem>>, vector<1x16x128xf32>
      %58 = vector.shape_cast %57 : vector<1x16x128xf32> to vector<16x128xf32>
      %59 = vector.shape_cast %56 : vector<16x128xf32> to vector<1x16x128xf32>
      tpu.vector_store %arg5[%c0_30, %c0_31, %c0_32], %59 {strides = array<i32>} : memref<1x16x128xf32, #tpu.memory_space<vmem>>, vector<1x16x128xf32>,
      %cst_33 = arith.constant 0.000000e+00 : f32
      %60 = vector.broadcast %cst_33 : f32 to vector<16x128xf32>
      %c0_34 = arith.constant 0 : index
      %c0_35 = arith.constant 0 : index
      %c0_36 = arith.constant 0 : index
      %61 = vector.load %arg6[%c0_34, %c0_35, %c0_36] : memref<1x16x128xf32, #tpu.memory_space<vmem>>, vector<1x16x128xf32>
      %62 = vector.shape_cast %61 : vector<1x16x128xf32> to vector<16x128xf32>
      %63 = vector.shape_cast %60 : vector<16x128xf32> to vector<1x16x128xf32>
      tpu.vector_store %arg6[%c0_34, %c0_35, %c0_36], %63 {strides = array<i32>} : memref<1x16x128xf32, #tpu.memory_space<vmem>>, vector<1x16x128xf32>,
    } else {
    }
    %c0_i32_1 = arith.constant 0 : i32
    %c128_i32 = arith.constant 128 : i32
    %3 = arith.muli %c0_i32_1, %c128_i32 : i32
    %4 = tpu.assume_multiple %3, 128 : i32
    %c0 = arith.constant 0 : index
    %5 = arith.index_cast %4 : i32 to index
    %6 = vector.load %arg2[%c0, %5] : memref<16x128xf32, #tpu.memory_space<vmem>>, vector<16x128xf32>
    %c0_2 = arith.constant 0 : index
    %7 = arith.index_cast %4 : i32 to index
    %8 = vector.load %arg3[%c0_2, %7] : memref<16x128xf32, #tpu.memory_space<vmem>>, vector<16x128xf32>
    %9 = math.absf %6 : vector<16x128xf32>
    %cst = arith.constant 0.000000e+00 : f32
    %10 = vector.broadcast %cst : f32 to vector<16x128xf32>
    %11 = arith.subf %10, %9 : vector<16x128xf32>
    %12 = math.exp %11 : vector<16x128xf32>
    %cst_3 = arith.constant 1.000000e+00 : f32
    %13 = vector.broadcast %cst_3 : f32 to vector<16x128xf32>
    %14 = arith.addf %13, %12 : vector<16x128xf32>
    %15 = tpu.reciprocal %14 {approx = true} : vector<16x128xf32> -> vector<16x128xf32>
    %16 = arith.mulf %14, %15 : vector<16x128xf32>
    %cst_4 = arith.constant 2.000000e+00 : f32
    %17 = vector.broadcast %cst_4 : f32 to vector<16x128xf32>
    %18 = arith.subf %17, %16 : vector<16x128xf32>
    %19 = arith.mulf %15, %18 : vector<16x128xf32>
    %cst_5 = arith.constant 0.000000e+00 : f32
    %20 = vector.broadcast %cst_5 : f32 to vector<16x128xf32>
    %21 = arith.cmpf oge, %6, %20 : vector<16x128xf32>
    %22 = arith.mulf %12, %19 : vector<16x128xf32>
    %23 = arith.select %21, %19, %22 : vector<16x128xi1>, vector<16x128xf32>
    %cst_6 = arith.constant 0.000000e+00 : f32
    %24 = vector.broadcast %cst_6 : f32 to vector<16x128xf32>
    %25 = arith.maximumf %6, %24 : vector<16x128xf32>
    %26 = arith.mulf %6, %8 : vector<16x128xf32>
    %27 = arith.subf %25, %26 : vector<16x128xf32>
    %28 = math.log %14 : vector<16x128xf32>
    %29 = arith.addf %27, %28 : vector<16x128xf32>
    %30 = arith.mulf %23, %8 : vector<16x128xf32>
    %31 = arith.mulf %23, %23 : vector<16x128xf32>
    %32 = arith.mulf %8, %8 : vector<16x128xf32>
    %33 = arith.addf %31, %32 : vector<16x128xf32>
    %c0_7 = arith.constant 0 : index
    %c0_8 = arith.constant 0 : index
    %c0_9 = arith.constant 0 : index
    %34 = vector.load %arg4[%c0_7, %c0_8, %c0_9] : memref<1x16x128xf32, #tpu.memory_space<vmem>>, vector<1x16x128xf32>
    %35 = vector.shape_cast %34 : vector<1x16x128xf32> to vector<16x128xf32>
    %36 = arith.addf %35, %30 : vector<16x128xf32>
    %c0_10 = arith.constant 0 : index
    %c0_11 = arith.constant 0 : index
    %c0_12 = arith.constant 0 : index
    %37 = vector.load %arg4[%c0_10, %c0_11, %c0_12] : memref<1x16x128xf32, #tpu.memory_space<vmem>>, vector<1x16x128xf32>
    %38 = vector.shape_cast %37 : vector<1x16x128xf32> to vector<16x128xf32>
    %39 = vector.shape_cast %36 : vector<16x128xf32> to vector<1x16x128xf32>
    tpu.vector_store %arg4[%c0_10, %c0_11, %c0_12], %39 {strides = array<i32>} : memref<1x16x128xf32, #tpu.memory_space<vmem>>, vector<1x16x128xf32>,
    %c0_13 = arith.constant 0 : index
    %c0_14 = arith.constant 0 : index
    %c0_15 = arith.constant 0 : index
    %40 = vector.load %arg5[%c0_13, %c0_14, %c0_15] : memref<1x16x128xf32, #tpu.memory_space<vmem>>, vector<1x16x128xf32>
    %41 = vector.shape_cast %40 : vector<1x16x128xf32> to vector<16x128xf32>
    %42 = arith.addf %41, %33 : vector<16x128xf32>
    %c0_16 = arith.constant 0 : index
    %c0_17 = arith.constant 0 : index
    %c0_18 = arith.constant 0 : index
    %43 = vector.load %arg5[%c0_16, %c0_17, %c0_18] : memref<1x16x128xf32, #tpu.memory_space<vmem>>, vector<1x16x128xf32>
    %44 = vector.shape_cast %43 : vector<1x16x128xf32> to vector<16x128xf32>
    %45 = vector.shape_cast %42 : vector<16x128xf32> to vector<1x16x128xf32>
    tpu.vector_store %arg5[%c0_16, %c0_17, %c0_18], %45 {strides = array<i32>} : memref<1x16x128xf32, #tpu.memory_space<vmem>>, vector<1x16x128xf32>,
    %c0_19 = arith.constant 0 : index
    %c0_20 = arith.constant 0 : index
    %c0_21 = arith.constant 0 : index
    %46 = vector.load %arg6[%c0_19, %c0_20, %c0_21] : memref<1x16x128xf32, #tpu.memory_space<vmem>>, vector<1x16x128xf32>
    %47 = vector.shape_cast %46 : vector<1x16x128xf32> to vector<16x128xf32>
    %48 = arith.addf %47, %29 : vector<16x128xf32>
    %c0_22 = arith.constant 0 : index
    %c0_23 = arith.constant 0 : index
    %c0_24 = arith.constant 0 : index
    %49 = vector.load %arg6[%c0_22, %c0_23, %c0_24] : memref<1x16x128xf32, #tpu.memory_space<vmem>>, vector<1x16x128xf32>
    %50 = vector.shape_cast %49 : vector<1x16x128xf32> to vector<16x128xf32>
    %51 = vector.shape_cast %48 : vector<16x128xf32> to vector<1x16x128xf32>
    tpu.vector_store %arg6[%c0_22, %c0_23, %c0_24], %51 {strides = array<i32>} : memref<1x16x128xf32, #tpu.memory_space<vmem>>, vector<1x16x128xf32>,
    %c1_i32 = arith.constant 1 : i32
    return
  }
  func.func @transform_0(%arg0: i32, %arg1: i32) -> (i32, i32) {
    %c1_i32 = arith.constant 1 : i32
    %0 = arith.muli %arg0, %c1_i32 : i32
    %1 = arith.addi %0, %arg1 : i32
    %c0_i32 = arith.constant 0 : i32
    %2 = arith.minsi %1, %c0_i32 : i32
    %c0_i32_0 = arith.constant 0 : i32
    %c0_i32_1 = arith.constant 0 : i32
    return %c0_i32_0, %2 : i32, i32
  }
  func.func @transform_1(%arg0: i32, %arg1: i32) -> (i32, i32) {
    %c1_i32 = arith.constant 1 : i32
    %0 = arith.muli %arg0, %c1_i32 : i32
    %1 = arith.addi %0, %arg1 : i32
    %c0_i32 = arith.constant 0 : i32
    %2 = arith.minsi %1, %c0_i32 : i32
    %c0_i32_0 = arith.constant 0 : i32
    %c0_i32_1 = arith.constant 0 : i32
    return %c0_i32_0, %2 : i32, i32
  }
  func.func @transform_2(%arg0: i32, %arg1: i32) -> (i32, i32, i32) {
    %c0_i32 = arith.constant 0 : i32
    %c0_i32_0 = arith.constant 0 : i32
    %c0_i32_1 = arith.constant 0 : i32
    return %arg0, %c0_i32, %c0_i32_0 : i32, i32, i32
  }
  func.func @transform_3(%arg0: i32, %arg1: i32) -> (i32, i32, i32) {
    %c0_i32 = arith.constant 0 : i32
    %c0_i32_0 = arith.constant 0 : i32
    %c0_i32_1 = arith.constant 0 : i32
    return %arg0, %c0_i32, %c0_i32_0 : i32, i32, i32
  }
  func.func @transform_4(%arg0: i32, %arg1: i32) -> (i32, i32, i32) {
    %c0_i32 = arith.constant 0 : i32
    %c0_i32_0 = arith.constant 0 : i32
    %c0_i32_1 = arith.constant 0 : i32
    return %arg0, %c0_i32, %c0_i32_0 : i32, i32, i32
  }
}

</mosaic_0001>

<bundles_post_ra>
// kernel: tpu_custom_call.1
= control target key start
LH: loop header
LB: loop body
LE: loop exit
PB: predicated region body
PF: predicated region fallthrough
CT: control target
= control target key end

     0   :  { %10 = vsyncpa [#allocation3], 0  ;;  %s448_s0 = inlined_call_operand.hbm [shape: f32[16,128], index: 0, kind: input, shape index: {}]   ;;  %s449_s1 = inlined_call_operand.hbm [shape: f32[16,128], index: 1, kind: input, shape index: {}]   ;;  %s450_s2 = inlined_call_operand.hbm [shape: f32[1,16,128], index: 2, kind: output, shape index: {0}]   ;;  %s451_s3 = inlined_call_operand.hbm [shape: f32[1,16,128], index: 3, kind: output, shape index: {1}]   ;;  %s452_s4 = inlined_call_operand.hbm [shape: f32[1,16,128], index: 4, kind: output, shape index: {2}]  }
   0x1   :  { %11 = vsyncpa [#allocation6], 0 }
   0x2   :  { %12 = vsyncpa [#allocation4], 0 }
   0x3   :  { %13 = vsyncpa [#allocation9], 0  ;;  %s327_s15 = smov [#allocation2]   ;;  %s209_s19 = scalar_lea.hbm %s448_s0, 256 }
   0x4   :  { %s24_s16 = sshll.u32 %s327_s15, 4  ;;  %p210_p0 = scmp.ne.s32.totalorder %s448_s0, %s209_s19  ;;  %s25_s16 = int_to_ptr.vmem [resolvable:$true] %s24_s16 }
   0x5   :  { %p213_p1 = scmp.lt.u32.totalorder %s209_s19, %s448_s0 }
   0x7   :  { %p215_p2 = pnand %p213_p1, %p210_p0 }
   0x9   :  { %218 = shalt.err (!%p215_p2)
}
   0xa   :  { %s219_s24 = scalar_lea.vmem %s25_s16, 256  ;;  %p224_p4 = scmp.lt.s32.totalorder %s25_s16, %s25_s16 }
   0xb   :  { %p220_p3 = scmp.ne.s32.totalorder %s25_s16, %s219_s24  ;;  %p225_p5 = scmp.lt.s32.totalorder %s219_s24, %s219_s24 }
   0xd   :  { %p226_p6 = por %p225_p5, %p224_p4 }
   0xf   :  { %p227_p7 = pnand %p226_p6, %p220_p3 }
  0x11   :  { %230 = shalt.err (!%p227_p7)
}
  0x12   :  { %s328_s25 = smov 128   ;;  %s329_s26 = smov 8  }
  0x13   :  { %30 = dma.hbm_to_vmem [thread:$0]  %s448_s0, 256, %s25_s16, [#allocation3], %s328_s25, %s328_s25, %s329_s26  }
  0x14   :  { %s330_s29 = smov [#allocation5]   ;;  %s231_s7 = scalar_lea.hbm %s449_s1, 256 }
  0x15   :  { %s41_s30 = sshll.u32 %s330_s29, 4  ;;  %p232_p8 = scmp.ne.s32.totalorder %s449_s1, %s231_s7  ;;  %s42_s30 = int_to_ptr.vmem [resolvable:$true] %s41_s30 }
  0x16   :  { %p235_p9 = scmp.lt.u32.totalorder %s231_s7, %s449_s1 }
  0x18   :  { %p237_p10 = pnand %p235_p9, %p232_p8 }
  0x1a   :  { %240 = shalt.err (!%p237_p10)
}
  0x1b   :  { %s241_s12 = scalar_lea.vmem %s42_s30, 256  ;;  %p246_p12 = scmp.lt.s32.totalorder %s42_s30, %s42_s30 }
  0x1c   :  { %p242_p11 = scmp.ne.s32.totalorder %s42_s30, %s241_s12  ;;  %p247_p13 = scmp.lt.s32.totalorder %s241_s12, %s241_s12 }
  0x1e   :  { %p248_p0 = por %p247_p13, %p246_p12 }
  0x20   :  { %p249_p1 = pnand %p248_p0, %p242_p11 }
  0x22   :  { %252 = shalt.err (!%p249_p1)
}
  0x23   :  { %47 = dma.hbm_to_vmem [thread:$0]  %s449_s1, 256, %s42_s30, [#allocation6], %s328_s25, %s328_s25, %s329_s26  }
  0x24   :  { %319 = dma.done.wait [#allocation3], 256  }
  0x25   :  { %320 = vsyncadd [#allocation3], 4294967040 }
  0x26   :  { %321 = dma.done.wait [#allocation6], 256  }
  0x27   :  { %322 = vsyncadd [#allocation6], 4294967040  ;;  %v70_v0 = vld [vmem:[#allocation2] sm:$0xff]  ;;  %v71_v1 = vld [vmem:[#allocation2 + $0x8] sm:$0xff]  ;;  %s331_s1 = smov [#allocation7]   ;;  %s332_s15 = smov [#allocation8]  }
  0x28   :  { %v74_v2 = vand.u32 2147483647, %v70_v0  ;;  %v75_v3 = vand.u32 2147483647, %v71_v1  ;;  %v72_v12 = vld [vmem:[#allocation5] sm:$0xff]  ;;  %v73_v13 = vld [vmem:[#allocation5 + $0x8] sm:$0xff] }
  0x29   :  { %v98_v14 = vmax.f32 %v70_v0, 0.0  ;;  %v100_v15 = vmul.f32 %v72_v12, %v70_v0  ;;  %v99_v16 = vmax.f32 %v71_v1, 0.0  ;;  %v101_v17 = vmul.f32 %v73_v13, %v71_v1  ;;  %s141_s14 = sshll.u32 %s331_s1, 4  ;;  %s153_s16 = sshll.u32 %s332_s15, 4  ;;  %s142_s14 = int_to_ptr.vmem [resolvable:$true] %s141_s14  ;;  %s389_s16 = int_to_ptr.vmem [resolvable:$true] %s153_s16 }
  0x2a   :  { %v76_v4 = vsub.f32 0.0, %v74_v2  ;;  %v77_v5 = vsub.f32 0.0, %v75_v3  ;;  %vm92_vm0 = vcmp.ge.f32.partialorder %v70_v0, 0.0  ;;  %vm93_vm1 = vcmp.ge.f32.partialorder %v71_v1, 0.0  ;;  %s333_s17 = smov [#allocation10]   ;;  %s253_s19 = scalar_lea.vmem %s142_s14, 256 }
  0x2b   :  { %v102_v21 = vsub.f32 %v98_v14, %v100_v15  ;;  %v103_v24 = vsub.f32 %v99_v16, %v101_v17  ;;  %v114_v35 = vmul.f32 %v72_v12, %v72_v12  ;;  %v115_v38 = vmul.f32 %v73_v13, %v73_v13  ;;  %s165_s18 = sshll.u32 %s333_s17, 4  ;;  %p254_p2 = scmp.ne.s32.totalorder %s142_s14, %s253_s19  ;;  %s391_s18 = int_to_ptr.vmem [resolvable:$true] %s165_s18 }
  0x2c   :  { %v78_v6 = vmul.f32 1.442695, %v76_v4  ;;  %v80_v7 = vmul.f32 1.442695, %v77_v5  ;;  %p258_p3 = scmp.lt.s32.totalorder %s142_s14, %s142_s14  ;;  %p259_p4 = scmp.lt.s32.totalorder %s253_s19, %s253_s19 }
  0x2e   :  { %197 = vpow2.f32 %v78_v6  ;;  %p260_p5 = por %p259_p4, %p258_p3 }
  0x2f   :  { %199 = vpow2.f32 %v80_v7 }
  0x30   :  { %p261_p6 = pnand %p260_p5, %p254_p2 }
  0x38   :  { %v198_v8 = vpop.eup %197 }
  0x39   :  { %v200_v9 = vpop.eup %199  ;;  %v82_v10 = vadd.f32 1.0, %v198_v8 }
  0x3a   :  { %v83_v11 = vadd.f32 1.0, %v200_v9 }
  0x3b   :  { %201 = vrcp.f32 %v82_v10 }
  0x3c   :  { %203 = vrcp.f32 %v83_v11 }
  0x3d   :  { %205 = vlog2.f32 %v82_v10 }
  0x3e   :  { %207 = vlog2.f32 %v83_v11 }
  0x45   :  { %v202_v18 = vpop.eup %201 }
  0x46   :  { %v204_v19 = vpop.eup %203  ;;  %v86_v20 = vmul.f32 %v202_v18, %v82_v10 }
  0x47   :  { %v206_v22 = vpop.eup %205  ;;  %v87_v23 = vmul.f32 %v204_v19, %v83_v11 }
  0x48   :  { %v208_v25 = vpop.eup %207  ;;  %v88_v26 = vsub.f32 2.0, %v86_v20  ;;  %v105_v27 = vmul.f32 0.6931472, %v206_v22 }
  0x49   :  { %v89_v28 = vsub.f32 2.0, %v87_v23  ;;  %v107_v29 = vmul.f32 0.6931472, %v208_v25 }
  0x4a   :  { %v90_v30 = vmul.f32 %v202_v18, %v88_v26  ;;  %v108_v31 = vadd.f32 %v105_v27, %v102_v21 }
  0x4b   :  { %v91_v32 = vmul.f32 %v204_v19, %v89_v28  ;;  %v109_v33 = vadd.f32 %v107_v29, %v103_v24 }
  0x4c   :  { %v94_v34 = vmul.f32 %v198_v8, %v90_v30  ;;  %134 = vst [vmem:[#allocation10] sm:$0xff] %v108_v31 }
  0x4d   :  { %v95_v36 = vmul.f32 %v200_v9, %v91_v32  ;;  %135 = vst [vmem:[#allocation10 + $0x8] sm:$0xff] %v109_v33 }
  0x4e   :  { %v96_v37 = vsel %vm92_vm0, %v90_v30, %v94_v34 }
  0x4f   :  { %v112_v39 = vmul.f32 %v96_v37, %v96_v37  ;;  %v97_v40 = vsel %vm93_vm1, %v91_v32, %v95_v36  ;;  %v110_v41 = vmul.f32 %v96_v37, %v72_v12 }
  0x50   :  { %v113_v42 = vmul.f32 %v97_v40, %v97_v40  ;;  %v111_v43 = vmul.f32 %v97_v40, %v73_v13 }
  0x51   :  { %v116_v44 = vadd.f32 %v114_v35, %v112_v39  ;;  %122 = vst [vmem:[#allocation7] sm:$0xff] %v110_v41 }
  0x52   :  { %v117_v45 = vadd.f32 %v115_v38, %v113_v42  ;;  %123 = vst [vmem:[#allocation7 + $0x8] sm:$0xff] %v111_v43 }
  0x53   :  { %128 = vst [vmem:[#allocation8] sm:$0xff] %v116_v44 }
  0x54   :  { %264 = shalt.err (!%p261_p6)
}
  0x55   :  { %s265_s22 = scalar_lea.hbm %s450_s2, 256 }
  0x56   :  { %p266_p7 = scmp.ne.s32.totalorder %s450_s2, %s265_s22  ;;  %p269_p8 = scmp.lt.u32.totalorder %s265_s22, %s450_s2 }
  0x58   :  { %p271_p9 = pnand %p269_p8, %p266_p7 }
  0x5a   :  { %274 = shalt.err (!%p271_p9)
}
  0x5b   :  { %147 = dma.vmem_to_hbm [thread:$0]  %s142_s14, 256, %s450_s2, [#allocation4], %s328_s25, %s328_s25, %s329_s26   ;;  %129 = vst [vmem:[#allocation8 + $0x8] sm:$0xff] %v117_v45 }
  0x5c   :  { %s275_s5 = scalar_lea.vmem %s389_s16, 256  ;;  %p280_p11 = scmp.lt.s32.totalorder %s389_s16, %s389_s16 }
  0x5d   :  { %p276_p10 = scmp.ne.s32.totalorder %s389_s16, %s275_s5  ;;  %p281_p12 = scmp.lt.s32.totalorder %s275_s5, %s275_s5 }
  0x5f   :  { %p282_p13 = por %p281_p12, %p280_p11 }
  0x61   :  { %p283_p0 = pnand %p282_p13, %p276_p10 }
  0x63   :  { %286 = shalt.err (!%p283_p0)
}
  0x64   :  { %s287_s8 = scalar_lea.hbm %s451_s3, 256 }
  0x65   :  { %p288_p1 = scmp.ne.s32.totalorder %s451_s3, %s287_s8  ;;  %p291_p2 = scmp.lt.u32.totalorder %s287_s8, %s451_s3 }
  0x67   :  { %p293_p3 = pnand %p291_p2, %p288_p1 }
  0x69   :  { %296 = shalt.err (!%p293_p3)
}
  0x6a   :  { %159 = dma.vmem_to_hbm [thread:$0]  %s389_s16, 256, %s451_s3, [#allocation9], %s328_s25, %s328_s25, %s329_s26  }
  0x6b   :  { %s297_s13 = scalar_lea.vmem %s391_s18, 256  ;;  %p302_p5 = scmp.lt.s32.totalorder %s391_s18, %s391_s18 }
  0x6c   :  { %p298_p4 = scmp.ne.s32.totalorder %s391_s18, %s297_s13  ;;  %p303_p6 = scmp.lt.s32.totalorder %s297_s13, %s297_s13 }
  0x6e   :  { %p304_p7 = por %p303_p6, %p302_p5 }
  0x70   :  { %p305_p8 = pnand %p304_p7, %p298_p4 }
  0x72   :  { %308 = shalt.err (!%p305_p8)
}
  0x73   :  { %s309_s15 = scalar_lea.hbm %s452_s4, 256 }
  0x74   :  { %p310_p9 = scmp.ne.s32.totalorder %s452_s4, %s309_s15  ;;  %p313_p10 = scmp.lt.u32.totalorder %s309_s15, %s452_s4 }
  0x76   :  { %p315_p11 = pnand %p313_p10, %p310_p9 }
  0x78   :  { %318 = shalt.err (!%p315_p11)
}
  0x79   :  { %171 = dma.vmem_to_hbm [thread:$0]  %s391_s18, 256, %s452_s4, [#allocation9], %s328_s25, %s328_s25, %s329_s26  }
  0x7a   :  { %323 = dma.done.wait [#allocation4], 256  }
  0x7b   :  { %324 = vsyncadd [#allocation4], 4294967040 }
  0x7c   :  { %325 = dma.done.wait [#allocation9], 512  }
  0x7d   :  { %326 = vsyncadd [#allocation9], 4294966784 }
  0x7e   :  { %181 = vsyncpa [#allocation3], 1 }
  0x7f   :  { %182 = vsyncpa [#allocation6], 1 }
  0x80   :  { %183 = vsyncpa [#allocation4], 1 }
  0x81   :  { %184 = vsyncpa [#allocation9], 1 }

</bundles_post_ra>
